<compile_context>
chip_gen: v5e
topology: v5e:2x2
jax: 0.10.0
libtpu: 0.0.40
codegen_flags: <defaults>
</compile_context>

<pallas_src>
import jax
import jax.numpy as jnp
from jax.experimental import pallas as pl
from jax.experimental.pallas import tpu as pltpu


# ---- Pallas kernel ------------------------------------------------------------
def _unormalize_kernel(x_ref, o_ref):
    # x_ref / o_ref : (block_rows, cols) VMEM tiles.
    x = x_ref[...]
    x = jnp.clip(x, -1.0, 1.0)          # torch.clamp(x, -1.0, 1.0)
    o_ref[...] = (x + 1.0) * 0.5        # (x + 1) / 2


# ---- wrapper ------------------------------------------------------------------
def my_unormalize(x):
    """Elementwise clamp(-1,1) then (x+1)/2, computed in a Pallas TPU kernel."""
    orig_shape = x.shape
    orig_dtype = x.dtype
    total = x.size

    # Present a lane-dense 2-D slab to the kernel: last dim 128 if possible,
    # otherwise fall back to the array's own trailing dim.
    if total % 128 == 0:
        cols = 128
        rows = total // 128
    else:
        cols = orig_shape[-1] if len(orig_shape) >= 1 else 1
        rows = total // cols
    x2 = x.reshape(rows, cols)

    # Block choice: single step for small inputs (no per-step overhead),
    # large 8-aligned row tiles otherwise (Pallas masks the ragged tail).
    if rows <= 2048:
        block_rows = rows
    else:
        block_rows = 1024

    grid = (pl.cdiv(rows, block_rows),)

    out2 = pl.pallas_call(
        _unormalize_kernel,
        out_shape=jax.ShapeDtypeStruct((rows, cols), orig_dtype),
        grid_spec=pltpu.PrefetchScalarGridSpec(
            num_scalar_prefetch=0,
            grid=grid,
            in_specs=[pl.BlockSpec((block_rows, cols), lambda i: (i, 0))],
            out_specs=pl.BlockSpec((block_rows, cols), lambda i: (i, 0)),
        ),
        compiler_params=pltpu.CompilerParams(
            dimension_semantics=("parallel",)),
    )(x2)

    return out2.reshape(orig_shape)


if __name__ == "__main__":
    key = jax.random.PRNGKey(0)
    B, C, H, W = 2, 4, 16, 16
    # Range (-2, 2) so the clamp branch is actually exercised.
    x = jax.random.uniform(key, (B, C, H, W), dtype=jnp.float32,
                           minval=-2.0, maxval=2.0)

    out = jax.jit(my_unormalize)(x)
    jax.block_until_ready(out)

    # Reference check in plain JAX.
    ref = (jnp.clip(x, -1.0, 1.0) + 1.0) / 2.0
    assert out.shape == x.shape
    assert bool(jnp.all(jnp.isfinite(out)))
    assert bool(jnp.allclose(out, ref, atol=1e-6, rtol=1e-6))

    print("KERNEL_OK")
</pallas_src>

<mosaic_0001>
module attributes {stable_mosaic.version = 11 : i64} {
  func.func @_unormalize_kernel(%arg0: i32, %arg1: memref<16x128xf32, #tpu.memory_space<vmem>>, %arg2: memref<16x128xf32, #tpu.memory_space<vmem>>) attributes {dimension_semantics = [#tpu.dimension_semantics<parallel>], iteration_bounds = array<i64: 1>, scalar_prefetch = 0 : i64, scratch_operands = 0 : i64, tpu.core_type = #tpu.core_type<tc>, window_params = [{transform_indices = @transform_0, window_bounds = array<i64: 16, 128>}, {transform_indices = @transform_1, window_bounds = array<i64: 16, 128>}]} {
    %c0 = arith.constant 0 : index
    %c0_0 = arith.constant 0 : index
    %0 = vector.load %arg1[%c0, %c0_0] : memref<16x128xf32, #tpu.memory_space<vmem>>, vector<16x128xf32>
    %cst = arith.constant -1.000000e+00 : f32
    %cst_1 = arith.constant 1.000000e+00 : f32
    %1 = vector.broadcast %cst : f32 to vector<16x128xf32>
    %2 = arith.maximumf %1, %0 : vector<16x128xf32>
    %3 = vector.broadcast %cst_1 : f32 to vector<16x128xf32>
    %4 = arith.minimumf %3, %2 : vector<16x128xf32>
    %cst_2 = arith.constant 1.000000e+00 : f32
    %5 = vector.broadcast %cst_2 : f32 to vector<16x128xf32>
    %6 = arith.addf %4, %5 : vector<16x128xf32>
    %cst_3 = arith.constant 5.000000e-01 : f32
    %7 = vector.broadcast %cst_3 : f32 to vector<16x128xf32>
    %8 = arith.mulf %6, %7 : vector<16x128xf32>
    %c0_4 = arith.constant 0 : index
    %c0_5 = arith.constant 0 : index
    %9 = vector.load %arg2[%c0_4, %c0_5] : memref<16x128xf32, #tpu.memory_space<vmem>>, vector<16x128xf32>
    tpu.vector_store %arg2[%c0_4, %c0_5], %8 {strides = array<i32>} : memref<16x128xf32, #tpu.memory_space<vmem>>, vector<16x128xf32>,
    return
  }
  func.func @transform_0(%arg0: i32) -> (i32, i32) {
    %c0_i32 = arith.constant 0 : i32
    %c0_i32_0 = arith.constant 0 : i32
    return %arg0, %c0_i32 : i32, i32
  }
  func.func @transform_1(%arg0: i32) -> (i32, i32) {
    %c0_i32 = arith.constant 0 : i32
    %c0_i32_0 = arith.constant 0 : i32
    return %arg0, %c0_i32 : i32, i32
  }
}

</mosaic_0001>

<bundles_post_ra>
// kernel: my_unormalize.1
= control target key start
LH: loop header
LB: loop body
LE: loop exit
PB: predicated region body
PF: predicated region fallthrough
CT: control target
= control target key end

     0   :  { %s48_s0 = inlined_call_operand.vmem [shape: f32[16,128], index: 0, kind: input, shape index: {}]   ;;  %s49_s1 = inlined_call_operand.vmem [shape: f32[16,128], index: 1, kind: output, shape index: {}]  }
   0x1   :  { %v8_v0 = vld [vmem:[%s48_s0] sm:$0xff]  ;;  %v9_v1 = vld [vmem:[%s48_s0 + $0x8] sm:$0xff] }
   0x2   :  { %v24_v2 = vclamps-f32 %v8_v0, 1.0  ;;  %v25_v3 = vclamps-f32 %v9_v1, 1.0 }
   0x4   :  { %v14_v4 = vadd.f32 1.0, %v24_v2  ;;  %v15_v5 = vadd.f32 1.0, %v25_v3 }
   0x6   :  { %v16_v6 = vmul.f32 0.5, %v14_v4  ;;  %v17_v7 = vmul.f32 0.5, %v15_v5 }
   0x8   :  { %18 = vst [vmem:[%s49_s1] sm:$0xff] %v16_v6 }
   0x9   :  { %19 = vst [vmem:[%s49_s1 + $0x8] sm:$0xff] %v17_v7 }

</bundles_post_ra>
